<compile_context>
chip_gen: v5e
topology: v5e:2x2
jax: 0.10.0
libtpu: 0.0.40
codegen_flags: <defaults>
</compile_context>

<pallas_src>
import jax
import jax.numpy as jnp
from jax.experimental import pallas as pl
from jax.experimental.pallas import tpu as pltpu

_LANES = 128
_MAX_TILE_ROWS = 2048        # (2048, 128) f32 block = 1 MiB; in+out double-buffered ~ 4 MiB VMEM
_SMALL_N_THRESHOLD = 1 << 16  # below this, dispatch to plain XLA (launch overhead dominates)


def _logreg_kernel(w_ref, b_ref, x_ref, o_ref):
    # w_ref / b_ref: (1, 1) f32 scalars in SMEM; x_ref / o_ref: (tile_rows, 128) f32 VMEM tiles.
    w = w_ref[0, 0]
    b = b_ref[0, 0]
    z = x_ref[...] * w + b                  # Linear(1, 1) degenerates to an elementwise affine (VPU)
    # sigmoid(z) == 0.5 * tanh(0.5 * z) + 0.5  -- tanh goes to the EUP slot, no f32 divide on VALU
    o_ref[...] = 0.5 * jnp.tanh(0.5 * z) + 0.5


def _pallas_sigmoid_affine(x2d, weight, bias, tile_rows):
    rows = x2d.shape[0]
    w_smem = weight.reshape(1, 1).astype(jnp.float32)
    b_smem = bias.reshape(1, 1).astype(jnp.float32)
    return pl.pallas_call(
        _logreg_kernel,
        out_shape=jax.ShapeDtypeStruct((rows, _LANES), jnp.float32),
        grid=(pl.cdiv(rows, tile_rows),),
        in_specs=[
            pl.BlockSpec(memory_space=pltpu.MemorySpace.SMEM),     # weight scalar
            pl.BlockSpec(memory_space=pltpu.MemorySpace.SMEM),     # bias scalar
            pl.BlockSpec((tile_rows, _LANES), lambda i: (i, 0)),   # x tile (lane-dense)
        ],
        out_specs=pl.BlockSpec((tile_rows, _LANES), lambda i: (i, 0)),
        compiler_params=pltpu.CompilerParams(
            dimension_semantics=("parallel",),   # megacore sharding of the grid (v7x: 2 TCs)
        ),
    )(w_smem, b_smem, x2d)


def logistic_regression_forward(x, weight, bias, *, small_n_threshold=_SMALL_N_THRESHOLD):
    """y = sigmoid(x @ weight.T + bias) with in_features == out_features == 1.

    x: (..., 1) f32; weight: (1, 1) f32; bias: (1,) f32 -> same shape as x.
    """
    orig_shape = x.shape
    x = x.astype(jnp.float32)
    n = int(x.size)

    w = weight.reshape(()).astype(jnp.float32)
    b = bias.reshape(()).astype(jnp.float32)

    if n == 0:
        return jnp.zeros(orig_shape, jnp.float32)

    if n < small_n_threshold:
        # Launch-overhead dominated: plain XLA, same math.
        return 0.5 * jnp.tanh(0.5 * (x * w + b)) + 0.5

    x_flat = jnp.ravel(x)

    if n % _LANES == 0:
        # Fast path (no pad, no output slice): ravel/reshape of a contiguous array is
        # layout-preserving, so no extra HBM passes around the bandwidth-bound kernel.
        # A ragged last grid block (rows % tile_rows != 0) is handled by Pallas edge
        # masking (OOB reads unspecified but discarded, OOB writes dropped).
        rows = n // _LANES
        tile_rows = rows if rows <= _MAX_TILE_ROWS else _MAX_TILE_ROWS
        y2d = _pallas_sigmoid_affine(x_flat.reshape(rows, _LANES), weight, bias, tile_rows)
        return y2d.reshape(orig_shape)

    # Ragged path: pad flat input up to whole tiles (one extra HBM pass each way; padded
    # tail just computes sigmoid(b) and is sliced off).
    rows = -(-n // _LANES)
    rows8 = -(-rows // 8) * 8                    # sublane-align when block < full array
    tile_rows = min(_MAX_TILE_ROWS, rows8)
    rows_padded = -(-rows // tile_rows) * tile_rows
    padded = rows_padded * _LANES

    x2d = jnp.pad(x_flat, (0, padded - n)).reshape(rows_padded, _LANES)
    y2d = _pallas_sigmoid_affine(x2d, weight, bias, tile_rows)
    return y2d.reshape(-1)[:n].reshape(orig_shape)


if __name__ == "__main__":
    key = jax.random.PRNGKey(0)
    k_w, k_b = jax.random.split(key, 2)

    # Deterministic init mimicking torch.nn.Linear(1, 1) default
    # (uniform in [-1/sqrt(fan_in), 1/sqrt(fan_in)] with fan_in = 1).
    weight = jax.random.uniform(k_w, (1, 1), jnp.float32, minval=-1.0, maxval=1.0)
    bias = jax.random.uniform(k_b, (1,), jnp.float32, minval=-1.0, maxval=1.0)

    # Input consistent with the original script: x = linspace(0, 10, 200) column vector.
    # small_n_threshold=0 forces the Pallas path so the kernel is exercised (ragged path).
    x = jnp.linspace(0.0, 10.0, 200, dtype=jnp.float32).reshape(200, 1)
    y = logistic_regression_forward(x, weight, bias, small_n_threshold=0)
    jax.block_until_ready(y)
    y_ref = jax.nn.sigmoid(x @ weight.T + bias)
    assert y.shape == (200, 1)
    assert jnp.allclose(y, y_ref, atol=1e-6), "mismatch vs reference (ragged path)"

    # Lane-aligned fast path (1024 = 8 * 128 elements -> zero-copy repack).
    x2 = jax.random.normal(jax.random.PRNGKey(1), (1024, 1), jnp.float32)
    y2 = logistic_regression_forward(x2, weight, bias, small_n_threshold=0)
    jax.block_until_ready(y2)
    y2_ref = jax.nn.sigmoid(x2 @ weight.T + bias)
    assert jnp.allclose(y2, y2_ref, atol=1e-6), "mismatch vs reference (aligned path)"

    print("KERNEL_OK")
</pallas_src>

<mosaic_0001>
module attributes {stable_mosaic.version = 11 : i64} {
  func.func @_logreg_kernel(%arg0: i32, %arg1: memref<1x1xf32, #tpu.memory_space<smem>>, %arg2: memref<1x1xf32, #tpu.memory_space<smem>>, %arg3: memref<8x128xf32, #tpu.memory_space<vmem>>, %arg4: memref<8x128xf32, #tpu.memory_space<vmem>>) attributes {dimension_semantics = [#tpu.dimension_semantics<parallel>], iteration_bounds = array<i64: 1>, scalar_prefetch = 0 : i64, scratch_operands = 0 : i64, tpu.core_type = #tpu.core_type<tc>, window_params = [{transform_indices = @transform_0, window_bounds = array<i64: 1, 1>}, {transform_indices = @transform_1, window_bounds = array<i64: 1, 1>}, {transform_indices = @transform_2, window_bounds = array<i64: 8, 128>}, {transform_indices = @transform_3, window_bounds = array<i64: 8, 128>}]} {
    %c0 = arith.constant 0 : index
    %c0_0 = arith.constant 0 : index
    %0 = memref.load %arg1[%c0, %c0_0] : memref<1x1xf32, #tpu.memory_space<smem>>
    %c0_1 = arith.constant 0 : index
    %c0_2 = arith.constant 0 : index
    %1 = memref.load %arg2[%c0_1, %c0_2] : memref<1x1xf32, #tpu.memory_space<smem>>
    %c0_3 = arith.constant 0 : index
    %c0_4 = arith.constant 0 : index
    %2 = vector.load %arg3[%c0_3, %c0_4] : memref<8x128xf32, #tpu.memory_space<vmem>>, vector<8x128xf32>
    %3 = vector.broadcast %0 : f32 to vector<8x128xf32>
    %4 = arith.mulf %2, %3 : vector<8x128xf32>
    %5 = vector.broadcast %1 : f32 to vector<8x128xf32>
    %6 = arith.addf %4, %5 : vector<8x128xf32>
    %cst = arith.constant 5.000000e-01 : f32
    %7 = vector.broadcast %cst : f32 to vector<8x128xf32>
    %8 = arith.mulf %7, %6 : vector<8x128xf32>
    %9 = math.tanh %8 : vector<8x128xf32>
    %cst_5 = arith.constant 5.000000e-01 : f32
    %10 = vector.broadcast %cst_5 : f32 to vector<8x128xf32>
    %11 = arith.mulf %10, %9 : vector<8x128xf32>
    %cst_6 = arith.constant 5.000000e-01 : f32
    %12 = vector.broadcast %cst_6 : f32 to vector<8x128xf32>
    %13 = arith.addf %11, %12 : vector<8x128xf32>
    %c0_7 = arith.constant 0 : index
    %c0_8 = arith.constant 0 : index
    %14 = vector.load %arg4[%c0_7, %c0_8] : memref<8x128xf32, #tpu.memory_space<vmem>>, vector<8x128xf32>
    tpu.vector_store %arg4[%c0_7, %c0_8], %13 {strides = array<i32>} : memref<8x128xf32, #tpu.memory_space<vmem>>, vector<8x128xf32>,
    return
  }
  func.func @transform_0(%arg0: i32) -> (i32, i32) {
    %c0_i32 = arith.constant 0 : i32
    %c0_i32_0 = arith.constant 0 : i32
    %c0_i32_1 = arith.constant 0 : i32
    return %c0_i32, %c0_i32_0 : i32, i32
  }
  func.func @transform_1(%arg0: i32) -> (i32, i32) {
    %c0_i32 = arith.constant 0 : i32
    %c0_i32_0 = arith.constant 0 : i32
    %c0_i32_1 = arith.constant 0 : i32
    return %c0_i32, %c0_i32_0 : i32, i32
  }
  func.func @transform_2(%arg0: i32) -> (i32, i32) {
    %c0_i32 = arith.constant 0 : i32
    %c0_i32_0 = arith.constant 0 : i32
    return %arg0, %c0_i32 : i32, i32
  }
  func.func @transform_3(%arg0: i32) -> (i32, i32) {
    %c0_i32 = arith.constant 0 : i32
    %c0_i32_0 = arith.constant 0 : i32
    return %arg0, %c0_i32 : i32, i32
  }
}

</mosaic_0001>

<bundles_post_ra>
// kernel: tpu_custom_call.1
= control target key start
LH: loop header
LB: loop body
LE: loop exit
PB: predicated region body
PF: predicated region fallthrough
CT: control target
= control target key end

     0   :  { %10 = vsyncpa [#allocation5], 0  ;;  %s150_s0 = inlined_call_operand.<no memory space> [shape: f32[1,1], index: 0, kind: input, shape index: {}]   ;;  %s151_s1 = inlined_call_operand.<no memory space> [shape: f32[1,1], index: 1, kind: input, shape index: {}]   ;;  %s152_s2 = inlined_call_operand.hbm [shape: f32[8,128], index: 2, kind: input, shape index: {}]   ;;  %s153_s3 = inlined_call_operand.hbm [shape: f32[8,128], index: 3, kind: output, shape index: {}]  }
   0x1   :  { %11 = vsyncpa [#allocation6], 0  ;;  %s21_s14 = sshll.u32 %s152_s2, 4  ;;  %s116_s15 = smov [#allocation4]   ;;  %s22_s14 = int_to_ptr.hbm [resolvable:$true] %s21_s14 }
   0x2   :  { %s23_s16 = sshll.u32 %s116_s15, 4  ;;  %s24_s16 = int_to_ptr.vmem [resolvable:$true] %s23_s16 }
   0x3   :  { %26 = dma.hbm_to_vmem [thread:$0]  %s22_s14, 128, %s24_s16, [#allocation5]  }
   0x4   :  { %112 = dma.done.wait [#allocation5], 128  }
   0x5   :  { %113 = vsyncadd [#allocation5], 4294967168  ;;  %v34_v0 = vstv %s150_s0  ;;  %v33_v1 = vld [vmem:[#allocation4] sm:$0xff]  ;;  %v36_v2 = vstv %s151_s1  ;;  %s117_s2 = smov [#allocation7]   ;;  %s50_s24 = sshll.u32 %s153_s3, 4  ;;  %s51_s24 = int_to_ptr.hbm [resolvable:$true] %s50_s24 }
   0x6   :  { %v35_v3 = vmul.f32 %v34_v0, %v33_v1  ;;  %s48_s21 = sshll.u32 %s117_s2, 4  ;;  %s49_s21 = int_to_ptr.vmem [resolvable:$true] %s48_s21 }
   0x8   :  { %v37_v4 = vadd.f32 %v36_v2, %v35_v3 }
   0xa   :  { %v38_v5 = vmul.f32 0.5, %v37_v4 }
   0xc   :  { %62 = vtanh.f32 %v38_v5 }
  0x12   :  { %v63_v6 = vpop.eup %62 }
  0x13   :  { %v40_v7 = vmul.f32 0.5, %v63_v6 }
  0x15   :  { %v41_v8 = vadd.f32 0.5, %v40_v7 }
  0x17   :  { %42 = vst [vmem:[#allocation7] sm:$0xff] %v41_v8 }
  0x18   :  { %53 = dma.vmem_to_hbm [thread:$0]  %s49_s21, 128, %s51_s24, [#allocation6]  }
  0x19   :  { %114 = dma.done.wait [#allocation6], 128  }
  0x1a   :  { %115 = vsyncadd [#allocation6], 4294967168 }
  0x1b   :  { %58 = vsyncpa [#allocation5], 1 }
  0x1c   :  { %59 = vsyncpa [#allocation6], 1 }

</bundles_post_ra>
